<compile_context>
chip_gen: v7x
topology: tpu7x:2x2x1
jax: 0.10.0
libtpu: 0.0.40
codegen_flags: <defaults>
</compile_context>

<pallas_src>
import functools

import jax
import jax.numpy as jnp
from jax.experimental import pallas as pl
from jax.experimental.pallas import tpu as pltpu


# ---------------------------------------------------------------------------
# helpers
# ---------------------------------------------------------------------------
def _round_up(x, m):
    return ((x + m - 1) // m) * m


def _sublane_min(dtype):
    """Minimum second-minor tile size for this dtype (8/16/32 rows)."""
    itemsize = jnp.dtype(dtype).itemsize
    if itemsize >= 4:
        return 8
    if itemsize == 2:
        return 16
    return 32


def _largest_divisor_tile(total, cap, step=128):
    """Largest multiple of `step` that divides `total` and is <= cap."""
    best = step
    t = step
    limit = min(cap, total)
    while t <= limit:
        if total % t == 0:
            best = t
        t += step
    return best


# ---------------------------------------------------------------------------
# Kernel 1: generic residual add  out = fn_out + x
# ---------------------------------------------------------------------------
def _residual_add_kernel(fn_out_ref, x_ref, o_ref):
    o_ref[...] = fn_out_ref[...] + x_ref[...]


def residual_add(fn_out, x, *, row_tile=512):
    """Elementwise fn(x) + x, tiled over rows (Pallas).

    Output aliases fn_out's buffer (no extra HBM allocation/writeback).
    """
    assert fn_out.shape == x.shape and fn_out.dtype == x.dtype
    orig_shape = x.shape
    d = orig_shape[-1]
    x2 = x.reshape(-1, d)
    f2 = fn_out.reshape(-1, d)
    n = x2.shape[0]

    itemsize = jnp.dtype(x.dtype).itemsize
    sub = _sublane_min(x.dtype)
    # Keep one (rt, d) block around ~4 MiB so 3 double-buffered operands stay
    # comfortably inside the scoped VMEM budget on every generation (incl. v7x).
    max_rows_by_vmem = max(sub, (4 * 1024 * 1024) // max(1, d * itemsize))
    rt = min(row_tile, _round_up(n, sub), max_rows_by_vmem)
    rt = max(sub, (rt // sub) * sub)

    n_pad = _round_up(n, rt)
    if n_pad != n:
        pad = ((0, n_pad - n), (0, 0))
        x2 = jnp.pad(x2, pad)
        f2 = jnp.pad(f2, pad)

    out = pl.pallas_call(
        _residual_add_kernel,
        out_shape=jax.ShapeDtypeStruct((n_pad, d), x.dtype),
        grid_spec=pltpu.PrefetchScalarGridSpec(
            num_scalar_prefetch=0,
            grid=(n_pad // rt,),
            in_specs=[
                pl.BlockSpec((rt, d), lambda i: (i, 0)),
                pl.BlockSpec((rt, d), lambda i: (i, 0)),
            ],
            out_specs=pl.BlockSpec((rt, d), lambda i: (i, 0)),
        ),
        compiler_params=pltpu.CompilerParams(
            dimension_semantics=("parallel",)),
        input_output_aliases={0: 0},  # reuse fn_out's HBM buffer for the output
        cost_estimate=pl.CostEstimate(
            flops=n_pad * d,
            transcendentals=0,
            bytes_accessed=3 * n_pad * d * itemsize),
    )(f2, x2)

    if n_pad != n:
        out = out[:n]
    return out.reshape(orig_shape)


# ---------------------------------------------------------------------------
# Kernel 2: fused Residual(Linear) — out = x @ W + b + x
# ---------------------------------------------------------------------------
def _residual_linear_kernel(x_ref, w_ref, b_ref, xres_ref, o_ref, acc_ref,
                            *, compute_dtype):
    k = pl.program_id(2)

    @pl.when(k == 0)
    def _():
        acc_ref[...] = jnp.zeros_like(acc_ref)

    xl = x_ref[...]
    wl = w_ref[...]
    if compute_dtype is not None:
        xl = xl.astype(compute_dtype)
        wl = wl.astype(compute_dtype)
    acc_ref[...] += jnp.dot(xl, wl, preferred_element_type=jnp.float32)

    @pl.when(k == pl.num_programs(2) - 1)
    def _():
        out = (acc_ref[...]
               + b_ref[...].astype(jnp.float32)
               + xres_ref[...].astype(jnp.float32))
        o_ref[...] = out.astype(o_ref.dtype)


def residual_linear(x, w, b, *, tm=256, tn=256, tk=512, compute_dtype=None):
    """Fused Residual(nn.Linear): (x @ W + b) + x, tiled matmul on the MXU.

    compute_dtype: optional MXU operand dtype (e.g. jnp.bfloat16 on v6e/v7x);
    accumulation and the epilogue stay in float32.
    """
    orig_shape = x.shape
    d = orig_shape[-1]
    assert w.shape == (d, d) and b.shape == (d,)
    x2 = x.reshape(-1, d)
    n = x2.shape[0]
    out_dtype = x.dtype
    itemsize = jnp.dtype(out_dtype).itemsize
    sub = _sublane_min(out_dtype)

    # ---- tile sizes --------------------------------------------------------
    d_pad = _round_up(d, 128)
    tk = _largest_divisor_tile(d_pad, tk)        # contraction tile (lane-dim of x)
    tn = _largest_divisor_tile(d_pad, tn)        # output-column tile
    tm = min(tm, _round_up(n, sub))              # row tile (full-height MXU LHS)
    tm = max(sub, (tm // sub) * sub)
    n_pad = _round_up(n, tm)

    # ---- zero padding (ragged rows / non-128-multiple D) --------------------
    if (n_pad, d_pad) != (n, d):
        x2 = jnp.pad(x2, ((0, n_pad - n), (0, d_pad - d)))
    w2 = jnp.pad(w, ((0, d_pad - d), (0, d_pad - d))) if d_pad != d else w
    b2 = jnp.pad(b, (0, d_pad - d)) if d_pad != d else b
    b2 = b2.reshape(1, d_pad)

    grid = (n_pad // tm, d_pad // tn, d_pad // tk)

    # ---- VMEM budget (double-buffered inputs/out + f32 accumulator) ---------
    tile_bytes = (2 * (tm * tk + tk * tn + tn + tm * tn) * itemsize
                  + 2 * tm * tn * itemsize
                  + tm * tn * 4)
    vmem_limit = int(min(max(2 * tile_bytes, 16 * 1024 * 1024),
                         48 * 1024 * 1024))

    cost = pl.CostEstimate(
        flops=2 * n * d * d,
        transcendentals=0,
        bytes_accessed=(2 * n * d + d * d + d + n * d) * itemsize)

    kernel = functools.partial(_residual_linear_kernel,
                               compute_dtype=compute_dtype)

    out = pl.pallas_call(
        kernel,
        out_shape=jax.ShapeDtypeStruct((n_pad, d_pad), out_dtype),
        grid_spec=pltpu.PrefetchScalarGridSpec(
            num_scalar_prefetch=0,
            grid=grid,
            in_specs=[
                pl.BlockSpec((tm, tk), lambda i, j, k: (i, k)),   # x (matmul LHS)
                pl.BlockSpec((tk, tn), lambda i, j, k: (k, j)),   # W tile
                pl.BlockSpec((1, tn), lambda i, j, k: (0, j)),    # bias row
                pl.BlockSpec((tm, tn), lambda i, j, k: (i, j)),   # x (residual)
            ],
            out_specs=pl.BlockSpec((tm, tn), lambda i, j, k: (i, j)),
            scratch_shapes=[pltpu.VMEM((tm, tn), jnp.float32)],
        ),
        compiler_params=pltpu.CompilerParams(
            dimension_semantics=("parallel", "parallel", "arbitrary"),
            vmem_limit_bytes=vmem_limit),
        cost_estimate=cost,
    )(x2, w2, b2, x2)

    if (n_pad, d_pad) != (n, d):
        out = out[:n, :d]
    return out.reshape(orig_shape)


# ---------------------------------------------------------------------------
# Residual wrapper (mirrors the PyTorch module)
# ---------------------------------------------------------------------------
class Residual:
    """Residual(fn): __call__(x, **kwargs) = fn(x, **kwargs) + x.

    fn is any JAX callable; the residual addition runs in a Pallas kernel
    whose output aliases fn's output buffer.
    """
    # TODO(synk): an arbitrary nn.Module `fn` cannot be lowered generically
    # into the Pallas kernel; only the residual add is in-kernel here (the
    # Linear demo path below is fully fused).

    def __init__(self, fn):
        self.fn = fn

    def __call__(self, x, **kwargs):
        return residual_add(self.fn(x, **kwargs), x)


if __name__ == "__main__":
    # Small ViT-ish shapes: batch=2, seq=8, hidden=128 (lane-dense last dim).
    B, S, D = 2, 8, 128
    key = jax.random.PRNGKey(0)
    kx, kw, kb = jax.random.split(key, 3)

    x = jax.random.normal(kx, (B, S, D), dtype=jnp.float32)
    # Deterministic inner-fn (Linear) params.
    w = jax.random.normal(kw, (D, D), dtype=jnp.float32) * (1.0 / D ** 0.5)
    b = jax.random.normal(kb, (D,), dtype=jnp.float32) * 0.01

    # --- Path A: generic Residual wrapper (fn in JAX, add in Pallas) --------
    fn = lambda t: jnp.dot(t, w) + b
    res = Residual(fn)
    out_generic = jax.block_until_ready(jax.jit(lambda t: res(t))(x))

    # --- Path B: fully fused Residual(Linear) Pallas kernel -----------------
    out_fused = jax.block_until_ready(jax.jit(residual_linear)(x, w, b))

    # Reference: fn(x) + x in plain JAX.
    ref = fn(x) + x

    assert out_generic.shape == x.shape and out_generic.dtype == x.dtype
    assert out_fused.shape == x.shape and out_fused.dtype == x.dtype
    assert jnp.allclose(out_generic, ref, atol=1e-5, rtol=1e-5)
    assert jnp.allclose(out_fused, ref, atol=1e-4, rtol=1e-4)

    print("KERNEL_OK")
</pallas_src>

<mosaic_0001>
module attributes {stable_mosaic.version = 11 : i64} {
  func.func @_residual_add_kernel(%arg0: i32, %arg1: memref<16x128xf32, #tpu.memory_space<vmem>>, %arg2: memref<16x128xf32, #tpu.memory_space<vmem>>, %arg3: memref<16x128xf32, #tpu.memory_space<vmem>>) attributes {dimension_semantics = [#tpu.dimension_semantics<parallel>], iteration_bounds = array<i64: 1>, scalar_prefetch = 0 : i64, scratch_operands = 0 : i64, tpu.core_type = #tpu.core_type<tc>, window_params = [{transform_indices = @transform_0, window_bounds = array<i64: 16, 128>}, {transform_indices = @transform_1, window_bounds = array<i64: 16, 128>}, {transform_indices = @transform_2, window_bounds = array<i64: 16, 128>}]} {
    %c0 = arith.constant 0 : index
    %c0_0 = arith.constant 0 : index
    %0 = vector.load %arg1[%c0, %c0_0] : memref<16x128xf32, #tpu.memory_space<vmem>>, vector<16x128xf32>
    %c0_1 = arith.constant 0 : index
    %c0_2 = arith.constant 0 : index
    %1 = vector.load %arg2[%c0_1, %c0_2] : memref<16x128xf32, #tpu.memory_space<vmem>>, vector<16x128xf32>
    %2 = arith.addf %0, %1 : vector<16x128xf32>
    %c0_3 = arith.constant 0 : index
    %c0_4 = arith.constant 0 : index
    %3 = vector.load %arg3[%c0_3, %c0_4] : memref<16x128xf32, #tpu.memory_space<vmem>>, vector<16x128xf32>
    tpu.vector_store %arg3[%c0_3, %c0_4], %2 {strides = array<i32>} : memref<16x128xf32, #tpu.memory_space<vmem>>, vector<16x128xf32>,
    return
  }
  func.func @transform_0(%arg0: i32) -> (i32, i32) {
    %c0_i32 = arith.constant 0 : i32
    %c0_i32_0 = arith.constant 0 : i32
    return %arg0, %c0_i32 : i32, i32
  }
  func.func @transform_1(%arg0: i32) -> (i32, i32) {
    %c0_i32 = arith.constant 0 : i32
    %c0_i32_0 = arith.constant 0 : i32
    return %arg0, %c0_i32 : i32, i32
  }
  func.func @transform_2(%arg0: i32) -> (i32, i32) {
    %c0_i32 = arith.constant 0 : i32
    %c0_i32_0 = arith.constant 0 : i32
    return %arg0, %c0_i32 : i32, i32
  }
}

</mosaic_0001>

<bundles_post_ra>
// kernel: _lambda_.1
= control target key start
LH: loop header
LB: loop body
LE: loop exit
PB: predicated region body
PF: predicated region fallthrough
CT: control target
= control target key end

     0   :  { %s56_s0 = inlined_call_operand.vmem [shape: f32[16,128], index: 0, kind: input, shape index: {}, may-alias: {0,2}]   ;;  %s57_s1 = inlined_call_operand.vmem [shape: f32[16,128], index: 1, kind: input, shape index: {}]   ;;  %s58_s2 = inlined_call_operand.vmem [shape: f32[16,128], index: 2, kind: output, shape index: {}, may-alias: {0,2}]  }
   0x1   :  { %v11_v0 = vld [vmem:[%s56_s0] sm:$0xff]  ;;  %v12_v2 = vld [vmem:[%s56_s0 + $0x8] sm:$0xff] }
   0x2   :  { %v13_v1 = vld [vmem:[%s57_s1] sm:$0xff]  ;;  %v14_v4 = vld [vmem:[%s57_s1 + $0x8] sm:$0xff] }
   0x3   :  { %v15_v3 = vadd.f32 %v13_v1, %v11_v0  ;;  %v16_v5 = vadd.f32 %v14_v4, %v12_v2 }
   0x5   :  { %17 = vst [vmem:[%s58_s2] sm:$0xff] %v15_v3  ;;  %18 = vst [vmem:[%s58_s2 + $0x8] sm:$0xff] %v16_v5 }

</bundles_post_ra>
